<compile_context>
chip_gen: v6e
topology: v6e:2x2x1
jax: 0.10.0
libtpu: 0.0.40
codegen_flags: <defaults>
</compile_context>

<pallas_src>
import functools

import jax
import jax.numpy as jnp
from jax.experimental import pallas as pl
from jax.experimental.pallas import tpu as pltpu

ALPHA = 10.0
ACT_BIT = 8
WEIGHT_BIT = 8
BIAS_BIT = 16

_ACT_SCALE = ALPHA / (2.0 ** ACT_BIT - 1.0)
_ACT_INV_SCALE = (2.0 ** ACT_BIT - 1.0) / ALPHA


def _relu_quant(x):
    """Clipped ReLU to [0, alpha] + uniform fake quantization of activations."""
    y = jnp.clip(x, 0.0, ALPHA)
    # multiply by the precomputed reciprocal scale (avoids per-element divide)
    return jnp.round(y * _ACT_INV_SCALE) * _ACT_SCALE


def _fake_quant_sym(w, bit):
    """Symmetric per-tensor fake quantization for (folded) weights / biases."""
    qmax = 2.0 ** (bit - 1) - 1.0
    max_abs = jnp.maximum(jnp.max(jnp.abs(w)), 1e-8)
    scale = qmax / max_abs
    return jnp.round(w * scale) / scale


def _pick_batch_tile(n, hw, max_lanes=4096):
    """Largest batch-tile NB dividing n with NB*hw <= max_lanes (>=1)."""
    nb = max(1, min(n, max_lanes // max(hw, 1)))
    while n % nb:
        nb -= 1
    return nb


def residual131_kernel(W, x_ref, w1_ref, b1_ref, w2_ref, b2_ref,
                       w3_ref, b3_ref, mask_ref, o_ref):
    """One batch-tile per grid step; lane axis = NB*H*W (lane-dense).

    x_ref   : (Cin,  L)        L = NB*H*W
    w1_ref  : (Cint, Cin)      w2_ref : (Cint, 9*Cint)   w3_ref : (Cout, Cint)
    b*_ref  : (C, 1)
    mask_ref: (9, 1, L)        per-tap zero-padding validity masks
    o_ref   : (Cout, L)
    """
    L = x_ref.shape[-1]
    x = x_ref[...]                                           # (Cin, L)

    # ---- l1: 1x1 conv (folded BN) + bias -> quantized clipped ReLU ---------
    h1 = jnp.dot(w1_ref[...], x, preferred_element_type=jnp.float32)
    h1 = _relu_quant(h1 + b1_ref[...])                       # (Cint, L)

    # ---- l2: 3x3 conv, padding=(1,1), stride=(1,1) --------------------------
    # im2col on the flattened lane axis: each tap is an XLU lane roll of h1
    # with out-of-image positions zeroed by a precomputed mask (the same masks
    # also kill any roll wrap-around across batch-element boundaries), then a
    # single MXU matmul with K = 9*Cint.
    parts = []
    for k in range(9):
        oy, ox = k // 3 - 1, k % 3 - 1
        off = oy * W + ox                                    # flat source offset
        shifted = h1 if off == 0 else pltpu.roll(h1, (-off) % L, 1)
        parts.append(shifted * mask_ref[k])                  # (Cint, L)
    patches = jnp.concatenate(parts, axis=0)                 # (9*Cint, L)
    h2 = jnp.dot(w2_ref[...], patches, preferred_element_type=jnp.float32)
    h2 = _relu_quant(h2 + b2_ref[...])                       # (Cint, L)

    # ---- l3: 1x1 conv + bias ------------------------------------------------
    out = jnp.dot(w3_ref[...], h2, preferred_element_type=jnp.float32)
    o_ref[...] = (out + b3_ref[...]).astype(o_ref.dtype)     # (Cout, L)


def quant_residual131(x_nchw, w1, b1, w2, b2, w3, b3):
    """x_nchw: (N, Cin, H, W) f32.  Weights: w1 (Cin,Cint), w2 (3,3,Cint,Cint),
    w3 (Cint,Cout); biases 1-D.  Returns (N, Cout, H, W) f32 (NCHW)."""
    N, Cin, H, W = x_nchw.shape
    Cint = w1.shape[1]
    Cout = w3.shape[1]
    HW = H * W
    NB = _pick_batch_tile(N, HW)
    L = NB * HW
    n_tiles = N // NB

    # lane-dense layout plumbing (wrapper-side, done once):
    # channels on sublanes, flattened (batch, H, W) on the lane axis.
    x_flat = jnp.transpose(x_nchw.reshape(N, Cin, HW), (1, 0, 2)).reshape(Cin, N * HW)

    w1t = jnp.transpose(w1)                                        # (Cint, Cin)
    w2m = jnp.transpose(w2, (3, 0, 1, 2)).reshape(Cint, 9 * Cint)  # (Cint, 9*Cint)
    w3t = jnp.transpose(w3)                                        # (Cout, Cint)
    b1c = b1.reshape(Cint, 1)
    b2c = b2.reshape(Cint, 1)
    b3c = b3.reshape(Cout, 1)

    # per-tap validity masks implementing the zero padding of the 3x3 conv,
    # tiled NB times along the lane axis (mask pattern repeats per batch elem).
    ys = jnp.arange(H).reshape(H, 1)
    xs = jnp.arange(W).reshape(1, W)
    masks = []
    for k in range(9):
        oy, ox = k // 3 - 1, k % 3 - 1
        m = ((ys + oy >= 0) & (ys + oy < H) & (xs + ox >= 0) & (xs + ox < W))
        masks.append(jnp.tile(m.reshape(HW), NB))
    mask = jnp.stack(masks, 0).astype(jnp.float32).reshape(9, 1, L)

    kernel = functools.partial(residual131_kernel, W)

    out_flat = pl.pallas_call(
        kernel,
        out_shape=jax.ShapeDtypeStruct((Cout, N * HW), jnp.float32),
        grid_spec=pltpu.PrefetchScalarGridSpec(
            num_scalar_prefetch=0,
            grid=(n_tiles,),
            in_specs=[
                pl.BlockSpec((Cin, L), lambda t: (0, t)),
                pl.BlockSpec((Cint, Cin), lambda t: (0, 0)),
                pl.BlockSpec((Cint, 1), lambda t: (0, 0)),
                pl.BlockSpec((Cint, 9 * Cint), lambda t: (0, 0)),
                pl.BlockSpec((Cint, 1), lambda t: (0, 0)),
                pl.BlockSpec((Cout, Cint), lambda t: (0, 0)),
                pl.BlockSpec((Cout, 1), lambda t: (0, 0)),
                pl.BlockSpec((9, 1, L), lambda t: (0, 0, 0)),
            ],
            out_specs=pl.BlockSpec((Cout, L), lambda t: (0, t)),
        ),
        compiler_params=pltpu.CompilerParams(
            dimension_semantics=("parallel",),        # batch tiles independent
            vmem_limit_bytes=32 * 1024 * 1024),
    )(x_flat, w1t, b1c, w2m, b2c, w3t, b3c, mask)

    out = out_flat.reshape(Cout, N, HW)
    return jnp.transpose(out, (1, 0, 2)).reshape(N, Cout, H, W)


def _reference_nchw(x_nchw, w1, b1, w2, b2, w3, b3):
    """Plain-JAX reference (same fake-quant semantics), NCHW in/out."""
    N, Cin, H, W = x_nchw.shape
    x = jnp.transpose(x_nchw, (0, 2, 3, 1))                     # NHWC
    h1 = _relu_quant(jnp.einsum('nhwc,cd->nhwd', x, w1) + b1)
    h1p = jnp.pad(h1, ((0, 0), (1, 1), (1, 1), (0, 0)))
    acc = jnp.zeros(h1.shape[:3] + (w2.shape[3],), jnp.float32)
    for dy in range(3):
        for dx in range(3):
            acc = acc + jnp.einsum('nhwc,cd->nhwd',
                                   h1p[:, dy:dy + H, dx:dx + W, :], w2[dy, dx])
    h2 = _relu_quant(acc + b2)
    out = jnp.einsum('nhwc,cd->nhwd', h2, w3) + b3
    return jnp.transpose(out, (0, 3, 1, 2))                     # NCHW


if __name__ == "__main__":
    # in_channels=4, int_channels=8, out_channels=4, batch=2, spatial=16
    N, Cin, Cint, Cout, H, W = 2, 4, 8, 4, 16, 16

    key = jax.random.PRNGKey(0)
    kx, k1, k2, k3, kb1, kb2, kb3 = jax.random.split(key, 7)

    x_nchw = jax.random.normal(kx, (N, Cin, H, W), dtype=jnp.float32)

    # deterministic synthetic folded parameters
    w1 = 0.3 * jax.random.normal(k1, (Cin, Cint), dtype=jnp.float32)
    w2 = 0.1 * jax.random.normal(k2, (3, 3, Cint, Cint), dtype=jnp.float32)
    w3 = 0.3 * jax.random.normal(k3, (Cint, Cout), dtype=jnp.float32)
    b1 = 0.05 * jax.random.normal(kb1, (Cint,), dtype=jnp.float32)
    b2 = 0.05 * jax.random.normal(kb2, (Cint,), dtype=jnp.float32)
    b3 = 0.05 * jax.random.normal(kb3, (Cout,), dtype=jnp.float32)

    # quantization=True, quant_method='scale': fake-quantize weights & biases
    w1q = _fake_quant_sym(w1, WEIGHT_BIT)
    w2q = _fake_quant_sym(w2, WEIGHT_BIT)
    w3q = _fake_quant_sym(w3, WEIGHT_BIT)
    b1q = _fake_quant_sym(b1, BIAS_BIT)
    b2q = _fake_quant_sym(b2, BIAS_BIT)
    b3q = _fake_quant_sym(b3, BIAS_BIT)

    out = quant_residual131(x_nchw, w1q, b1q, w2q, b2q, w3q, b3q)
    out = jax.block_until_ready(out)

    ref = jax.block_until_ready(_reference_nchw(x_nchw, w1q, b1q, w2q, b2q, w3q, b3q))

    assert out.shape == (N, Cout, H, W)
    assert bool(jnp.all(jnp.isfinite(out)))
    diff = jnp.abs(out - ref)
    # Loose tolerances: MXU-vs-XLA f32 numerics can flip an occasional
    # activation-quant rounding by one step (0.039); layout/indexing bugs
    # would produce O(1) errors over most elements.
    assert float(jnp.mean(diff)) < 1e-2, float(jnp.mean(diff))
    assert float(jnp.max(diff)) < 3e-1, float(jnp.max(diff))
    print("KERNEL_OK")
</pallas_src>

<mosaic_0001>
module attributes {stable_mosaic.version = 11 : i64} {
  func.func @residual131_kernel(%arg0: i32, %arg1: memref<4x512xf32, #tpu.memory_space<vmem>>, %arg2: memref<8x4xf32, #tpu.memory_space<vmem>>, %arg3: memref<8x1xf32, #tpu.memory_space<vmem>>, %arg4: memref<8x72xf32, #tpu.memory_space<vmem>>, %arg5: memref<8x1xf32, #tpu.memory_space<vmem>>, %arg6: memref<4x8xf32, #tpu.memory_space<vmem>>, %arg7: memref<4x1xf32, #tpu.memory_space<vmem>>, %arg8: memref<9x1x512xf32, #tpu.memory_space<vmem>>, %arg9: memref<4x512xf32, #tpu.memory_space<vmem>>) attributes {dimension_semantics = [#tpu.dimension_semantics<parallel>], iteration_bounds = array<i64: 1>, scalar_prefetch = 0 : i64, scratch_operands = 0 : i64, tpu.core_type = #tpu.core_type<tc>, window_params = [{transform_indices = @transform_0, window_bounds = array<i64: 4, 512>}, {pipeline_mode = #tpu.pipeline_mode<synchronous>, transform_indices = @transform_1, window_bounds = array<i64: 8, 4>}, {pipeline_mode = #tpu.pipeline_mode<synchronous>, transform_indices = @transform_2, window_bounds = array<i64: 8, 1>}, {pipeline_mode = #tpu.pipeline_mode<synchronous>, transform_indices = @transform_3, window_bounds = array<i64: 8, 72>}, {pipeline_mode = #tpu.pipeline_mode<synchronous>, transform_indices = @transform_4, window_bounds = array<i64: 8, 1>}, {pipeline_mode = #tpu.pipeline_mode<synchronous>, transform_indices = @transform_5, window_bounds = array<i64: 4, 8>}, {pipeline_mode = #tpu.pipeline_mode<synchronous>, transform_indices = @transform_6, window_bounds = array<i64: 4, 1>}, {pipeline_mode = #tpu.pipeline_mode<synchronous>, transform_indices = @transform_7, window_bounds = array<i64: 9, 1, 512>}, {transform_indices = @transform_8, window_bounds = array<i64: 4, 512>}]} {
    %c0 = arith.constant 0 : index
    %c0_0 = arith.constant 0 : index
    %0 = vector.load %arg1[%c0, %c0_0] : memref<4x512xf32, #tpu.memory_space<vmem>>, vector<4x512xf32>
    %c0_1 = arith.constant 0 : index
    %c0_2 = arith.constant 0 : index
    %1 = vector.load %arg2[%c0_1, %c0_2] : memref<8x4xf32, #tpu.memory_space<vmem>>, vector<8x4xf32>
    %cst = arith.constant dense<0.000000e+00> : vector<8x512xf32>
    %2 = tpu.matmul %1, %0, %cst {dimension_numbers = #tpu.dot_dimension_numbers<[1], [0], [0], [1], [0, 0, 1, 1], [], []>} : vector<8x4xf32>, vector<4x512xf32>, vector<8x512xf32> -> vector<8x512xf32>
    %c0_3 = arith.constant 0 : index
    %c0_4 = arith.constant 0 : index
    %3 = vector.load %arg3[%c0_3, %c0_4] : memref<8x1xf32, #tpu.memory_space<vmem>>, vector<8x1xf32>
    %4 = vector.broadcast %3 : vector<8x1xf32> to vector<8x512xf32>
    %5 = arith.addf %2, %4 : vector<8x512xf32>
    %cst_5 = arith.constant 0.000000e+00 : f32
    %cst_6 = arith.constant 1.000000e+01 : f32
    %6 = vector.broadcast %cst_5 : f32 to vector<8x512xf32>
    %7 = arith.maximumf %6, %5 : vector<8x512xf32>
    %8 = vector.broadcast %cst_6 : f32 to vector<8x512xf32>
    %9 = arith.minimumf %8, %7 : vector<8x512xf32>
    %cst_7 = arith.constant 2.550000e+01 : f32
    %10 = vector.broadcast %cst_7 : f32 to vector<8x512xf32>
    %11 = arith.mulf %9, %10 : vector<8x512xf32>
    %12 = math.roundeven %11 : vector<8x512xf32>
    %cst_8 = arith.constant 0.0392156877 : f32
    %13 = vector.broadcast %cst_8 : f32 to vector<8x512xf32>
    %14 = arith.mulf %12, %13 : vector<8x512xf32>
    %c17_i32 = arith.constant 17 : i32
    %15 = tpu.dynamic_rotate %14 by %c17_i32 dim 1 : vector<8x512xf32>, i32 -> vector<8x512xf32>
    %c0_9 = arith.constant 0 : index
    %c0_10 = arith.constant 0 : index
    %c0_11 = arith.constant 0 : index
    %16 = vector.load %arg8[%c0_9, %c0_10, %c0_11] : memref<9x1x512xf32, #tpu.memory_space<vmem>>, vector<1x1x512xf32>
    %17 = vector.shape_cast %16 : vector<1x1x512xf32> to vector<1x512xf32>
    %18 = vector.broadcast %17 : vector<1x512xf32> to vector<8x512xf32>
    %19 = arith.mulf %15, %18 : vector<8x512xf32>
    %c16_i32 = arith.constant 16 : i32
    %20 = tpu.dynamic_rotate %14 by %c16_i32 dim 1 : vector<8x512xf32>, i32 -> vector<8x512xf32>
    %c1 = arith.constant 1 : index
    %c0_12 = arith.constant 0 : index
    %c0_13 = arith.constant 0 : index
    %21 = vector.load %arg8[%c1, %c0_12, %c0_13] : memref<9x1x512xf32, #tpu.memory_space<vmem>>, vector<1x1x512xf32>
    %22 = vector.shape_cast %21 : vector<1x1x512xf32> to vector<1x512xf32>
    %23 = vector.broadcast %22 : vector<1x512xf32> to vector<8x512xf32>
    %24 = arith.mulf %20, %23 : vector<8x512xf32>
    %c15_i32 = arith.constant 15 : i32
    %25 = tpu.dynamic_rotate %14 by %c15_i32 dim 1 : vector<8x512xf32>, i32 -> vector<8x512xf32>
    %c2 = arith.constant 2 : index
    %c0_14 = arith.constant 0 : index
    %c0_15 = arith.constant 0 : index
    %26 = vector.load %arg8[%c2, %c0_14, %c0_15] : memref<9x1x512xf32, #tpu.memory_space<vmem>>, vector<1x1x512xf32>
    %27 = vector.shape_cast %26 : vector<1x1x512xf32> to vector<1x512xf32>
    %28 = vector.broadcast %27 : vector<1x512xf32> to vector<8x512xf32>
    %29 = arith.mulf %25, %28 : vector<8x512xf32>
    %c1_i32 = arith.constant 1 : i32
    %30 = tpu.dynamic_rotate %14 by %c1_i32 dim 1 : vector<8x512xf32>, i32 -> vector<8x512xf32>
    %c3 = arith.constant 3 : index
    %c0_16 = arith.constant 0 : index
    %c0_17 = arith.constant 0 : index
    %31 = vector.load %arg8[%c3, %c0_16, %c0_17] : memref<9x1x512xf32, #tpu.memory_space<vmem>>, vector<1x1x512xf32>
    %32 = vector.shape_cast %31 : vector<1x1x512xf32> to vector<1x512xf32>
    %33 = vector.broadcast %32 : vector<1x512xf32> to vector<8x512xf32>
    %34 = arith.mulf %30, %33 : vector<8x512xf32>
    %c4 = arith.constant 4 : index
    %c0_18 = arith.constant 0 : index
    %c0_19 = arith.constant 0 : index
    %35 = vector.load %arg8[%c4, %c0_18, %c0_19] : memref<9x1x512xf32, #tpu.memory_space<vmem>>, vector<1x1x512xf32>
    %36 = vector.shape_cast %35 : vector<1x1x512xf32> to vector<1x512xf32>
    %37 = vector.broadcast %36 : vector<1x512xf32> to vector<8x512xf32>
    %38 = arith.mulf %14, %37 : vector<8x512xf32>
    %c511_i32 = arith.constant 511 : i32
    %39 = tpu.dynamic_rotate %14 by %c511_i32 dim 1 : vector<8x512xf32>, i32 -> vector<8x512xf32>
    %c5 = arith.constant 5 : index
    %c0_20 = arith.constant 0 : index
    %c0_21 = arith.constant 0 : index
    %40 = vector.load %arg8[%c5, %c0_20, %c0_21] : memref<9x1x512xf32, #tpu.memory_space<vmem>>, vector<1x1x512xf32>
    %41 = vector.shape_cast %40 : vector<1x1x512xf32> to vector<1x512xf32>
    %42 = vector.broadcast %41 : vector<1x512xf32> to vector<8x512xf32>
    %43 = arith.mulf %39, %42 : vector<8x512xf32>
    %c497_i32 = arith.constant 497 : i32
    %44 = tpu.dynamic_rotate %14 by %c497_i32 dim 1 : vector<8x512xf32>, i32 -> vector<8x512xf32>
    %c6 = arith.constant 6 : index
    %c0_22 = arith.constant 0 : index
    %c0_23 = arith.constant 0 : index
    %45 = vector.load %arg8[%c6, %c0_22, %c0_23] : memref<9x1x512xf32, #tpu.memory_space<vmem>>, vector<1x1x512xf32>
    %46 = vector.shape_cast %45 : vector<1x1x512xf32> to vector<1x512xf32>
    %47 = vector.broadcast %46 : vector<1x512xf32> to vector<8x512xf32>
    %48 = arith.mulf %44, %47 : vector<8x512xf32>
    %c496_i32 = arith.constant 496 : i32
    %49 = tpu.dynamic_rotate %14 by %c496_i32 dim 1 : vector<8x512xf32>, i32 -> vector<8x512xf32>
    %c7 = arith.constant 7 : index
    %c0_24 = arith.constant 0 : index
    %c0_25 = arith.constant 0 : index
    %50 = vector.load %arg8[%c7, %c0_24, %c0_25] : memref<9x1x512xf32, #tpu.memory_space<vmem>>, vector<1x1x512xf32>
    %51 = vector.shape_cast %50 : vector<1x1x512xf32> to vector<1x512xf32>
    %52 = vector.broadcast %51 : vector<1x512xf32> to vector<8x512xf32>
    %53 = arith.mulf %49, %52 : vector<8x512xf32>
    %c495_i32 = arith.constant 495 : i32
    %54 = tpu.dynamic_rotate %14 by %c495_i32 dim 1 : vector<8x512xf32>, i32 -> vector<8x512xf32>
    %c8 = arith.constant 8 : index
    %c0_26 = arith.constant 0 : index
    %c0_27 = arith.constant 0 : index
    %55 = vector.load %arg8[%c8, %c0_26, %c0_27] : memref<9x1x512xf32, #tpu.memory_space<vmem>>, vector<1x1x512xf32>
    %56 = vector.shape_cast %55 : vector<1x1x512xf32> to vector<1x512xf32>
    %57 = vector.broadcast %56 : vector<1x512xf32> to vector<8x512xf32>
    %58 = arith.mulf %54, %57 : vector<8x512xf32>
    %59 = tpu.concatenate %19, %24, %29, %34, %38, %43, %48, %53, %58 in 0 : vector<8x512xf32>, vector<8x512xf32>, vector<8x512xf32>, vector<8x512xf32>, vector<8x512xf32>, vector<8x512xf32>, vector<8x512xf32>, vector<8x512xf32>, vector<8x512xf32> -> vector<72x512xf32>
    %c0_28 = arith.constant 0 : index
    %c0_29 = arith.constant 0 : index
    %60 = vector.load %arg4[%c0_28, %c0_29] : memref<8x72xf32, #tpu.memory_space<vmem>>, vector<8x72xf32>
    %cst_30 = arith.constant dense<0.000000e+00> : vector<8x512xf32>
    %61 = tpu.matmul %60, %59, %cst_30 {dimension_numbers = #tpu.dot_dimension_numbers<[1], [0], [0], [1], [0, 0, 1, 1], [], []>} : vector<8x72xf32>, vector<72x512xf32>, vector<8x512xf32> -> vector<8x512xf32>
    %c0_31 = arith.constant 0 : index
    %c0_32 = arith.constant 0 : index
    %62 = vector.load %arg5[%c0_31, %c0_32] : memref<8x1xf32, #tpu.memory_space<vmem>>, vector<8x1xf32>
    %63 = vector.broadcast %62 : vector<8x1xf32> to vector<8x512xf32>
    %64 = arith.addf %61, %63 : vector<8x512xf32>
    %cst_33 = arith.constant 0.000000e+00 : f32
    %cst_34 = arith.constant 1.000000e+01 : f32
    %65 = vector.broadcast %cst_33 : f32 to vector<8x512xf32>
    %66 = arith.maximumf %65, %64 : vector<8x512xf32>
    %67 = vector.broadcast %cst_34 : f32 to vector<8x512xf32>
    %68 = arith.minimumf %67, %66 : vector<8x512xf32>
    %cst_35 = arith.constant 2.550000e+01 : f32
    %69 = vector.broadcast %cst_35 : f32 to vector<8x512xf32>
    %70 = arith.mulf %68, %69 : vector<8x512xf32>
    %71 = math.roundeven %70 : vector<8x512xf32>
    %cst_36 = arith.constant 0.0392156877 : f32
    %72 = vector.broadcast %cst_36 : f32 to vector<8x512xf32>
    %73 = arith.mulf %71, %72 : vector<8x512xf32>
    %c0_37 = arith.constant 0 : index
    %c0_38 = arith.constant 0 : index
    %74 = vector.load %arg6[%c0_37, %c0_38] : memref<4x8xf32, #tpu.memory_space<vmem>>, vector<4x8xf32>
    %cst_39 = arith.constant dense<0.000000e+00> : vector<4x512xf32>
    %75 = tpu.matmul %74, %73, %cst_39 {dimension_numbers = #tpu.dot_dimension_numbers<[1], [0], [0], [1], [0, 0, 1, 1], [], []>} : vector<4x8xf32>, vector<8x512xf32>, vector<4x512xf32> -> vector<4x512xf32>
    %c0_40 = arith.constant 0 : index
    %c0_41 = arith.constant 0 : index
    %76 = vector.load %arg7[%c0_40, %c0_41] : memref<4x1xf32, #tpu.memory_space<vmem>>, vector<4x1xf32>
    %77 = vector.broadcast %76 : vector<4x1xf32> to vector<4x512xf32>
    %78 = arith.addf %75, %77 : vector<4x512xf32>
    %c0_42 = arith.constant 0 : index
    %c0_43 = arith.constant 0 : index
    %79 = vector.load %arg9[%c0_42, %c0_43] : memref<4x512xf32, #tpu.memory_space<vmem>>, vector<4x512xf32>
    tpu.vector_store %arg9[%c0_42, %c0_43], %78 {strides = array<i32>} : memref<4x512xf32, #tpu.memory_space<vmem>>, vector<4x512xf32>,
    return
  }
  func.func @transform_0(%arg0: i32) -> (i32, i32) {
    %c0_i32 = arith.constant 0 : i32
    %c0_i32_0 = arith.constant 0 : i32
    return %c0_i32, %arg0 : i32, i32
  }
  func.func @transform_1(%arg0: i32) -> (i32, i32) {
    %c0_i32 = arith.constant 0 : i32
    %c0_i32_0 = arith.constant 0 : i32
    %c0_i32_1 = arith.constant 0 : i32
    return %c0_i32, %c0_i32_0 : i32, i32
  }
  func.func @transform_2(%arg0: i32) -> (i32, i32) {
    %c0_i32 = arith.constant 0 : i32
    %c0_i32_0 = arith.constant 0 : i32
    %c0_i32_1 = arith.constant 0 : i32
    return %c0_i32, %c0_i32_0 : i32, i32
  }
  func.func @transform_3(%arg0: i32) -> (i32, i32) {
    %c0_i32 = arith.constant 0 : i32
    %c0_i32_0 = arith.constant 0 : i32
    %c0_i32_1 = arith.constant 0 : i32
    return %c0_i32, %c0_i32_0 : i32, i32
  }
  func.func @transform_4(%arg0: i32) -> (i32, i32) {
    %c0_i32 = arith.constant 0 : i32
    %c0_i32_0 = arith.constant 0 : i32
    %c0_i32_1 = arith.constant 0 : i32
    return %c0_i32, %c0_i32_0 : i32, i32
  }
  func.func @transform_5(%arg0: i32) -> (i32, i32) {
    %c0_i32 = arith.constant 0 : i32
    %c0_i32_0 = arith.constant 0 : i32
    %c0_i32_1 = arith.constant 0 : i32
    return %c0_i32, %c0_i32_0 : i32, i32
  }
  func.func @transform_6(%arg0: i32) -> (i32, i32) {
    %c0_i32 = arith.constant 0 : i32
    %c0_i32_0 = arith.constant 0 : i32
    %c0_i32_1 = arith.constant 0 : i32
    return %c0_i32, %c0_i32_0 : i32, i32
  }
  func.func @transform_7(%arg0: i32) -> (i32, i32, i32) {
    %c0_i32 = arith.constant 0 : i32
    %c0_i32_0 = arith.constant 0 : i32
    %c0_i32_1 = arith.constant 0 : i32
    %c0_i32_2 = arith.constant 0 : i32
    return %c0_i32, %c0_i32_0, %c0_i32_1 : i32, i32, i32
  }
  func.func @transform_8(%arg0: i32) -> (i32, i32) {
    %c0_i32 = arith.constant 0 : i32
    %c0_i32_0 = arith.constant 0 : i32
    return %c0_i32, %arg0 : i32, i32
  }
}

</mosaic_0001>

<bundles_post_ra>
// kernel: tpu_custom_call.1
= control target key start
LH: loop header
LB: loop body
LE: loop exit
PB: predicated region body
PF: predicated region fallthrough
CT: control target
= control target key end

     0   :  { %13 = vsyncpa [#allocation3], 0  ;;  %s1504_s0 = inlined_call_operand.hbm [shape: f32[4,512], index: 0, kind: input, shape index: {}]   ;;  %s1505_s1 = inlined_call_operand.vmem [shape: f32[8,4], index: 1, kind: input, shape index: {}]   ;;  %s1506_s2 = inlined_call_operand.vmem [shape: f32[8,1], index: 2, kind: input, shape index: {}]   ;;  %s1507_s3 = inlined_call_operand.vmem [shape: f32[8,72], index: 3, kind: input, shape index: {}]   ;;  %s1508_s4 = inlined_call_operand.vmem [shape: f32[8,1], index: 4, kind: input, shape index: {}]   ;;  %s1509_s5 = inlined_call_operand.hbm [shape: f32[4,8], index: 5, kind: input, shape index: {}]   ;;  %s1510_s6 = inlined_call_operand.vmem [shape: f32[4,1], index: 6, kind: input, shape index: {}]   ;;  %s1511_s7 = inlined_call_operand.vmem [shape: f32[9,1,512], index: 7, kind: input, shape index: {}]   ;;  %s1512_s8 = inlined_call_operand.hbm [shape: f32[4,512], index: 8, kind: output, shape index: {}]  }
   0x1   :  { %14 = vsyncpa [#allocation6], 0 }
   0x2   :  { %15 = vsyncpa [#allocation4], 0  ;;  %s1107_s27 = smov [#allocation2]   ;;  %s1108_s29 = smov [#allocation5]  }
   0x3   :  { %s22_s28 = sshll.u32 %s1107_s27, 4  ;;  %s40_s30 = sshll.u32 %s1108_s29, 4  ;;  %s23_s28 = int_to_ptr.vmem [resolvable:$true] %s22_s28  ;;  %s41_s30 = int_to_ptr.vmem [resolvable:$true] %s40_s30 }
   0x4   :  { %s1049_s9 = scalar_lea.vmem %s23_s28, 256  ;;  %p1054_p1 = scmp.lt.s32.totalorder %s23_s28, %s23_s28 }
   0x5   :  { %p1050_p0 = scmp.ne.s32.totalorder %s23_s28, %s1049_s9  ;;  %p1055_p2 = scmp.lt.s32.totalorder %s1049_s9, %s1049_s9 }
   0x7   :  { %p1056_p3 = por %p1055_p2, %p1054_p1 }
   0x9   :  { %p1057_p4 = pnand %p1056_p3, %p1050_p0 }
   0xb   :  { %1060 = shalt.err (!%p1057_p4)
}
   0xc   :  { %25 = dma.hbm_to_vmem [thread:$0]  %s1504_s0, 256, %s23_s28, [#allocation3]  }
   0xd   :  { %s1069_s12 = scalar_lea.vmem %s41_s30, 64  ;;  %p1074_p6 = scmp.lt.s32.totalorder %s41_s30, %s41_s30 }
   0xe   :  { %p1070_p5 = scmp.ne.s32.totalorder %s41_s30, %s1069_s12  ;;  %p1075_p7 = scmp.lt.s32.totalorder %s1069_s12, %s1069_s12 }
  0x10   :  { %p1076_p8 = por %p1075_p7, %p1074_p6 }
  0x12   :  { %p1077_p9 = pnand %p1076_p8, %p1070_p5 }
  0x14   :  { %1080 = shalt.err (!%p1077_p9)
}
  0x15   :  { %43 = dma.hbm_to_vmem [thread:$0]  %s1509_s5, 64, %s41_s30, [#allocation6]  }
  0x16   :  { %1101 = dma.done.wait [#allocation3], 256  }
  0x17   :  { %1102 = vsyncadd [#allocation3], 4294967040 }
  0x18   :  { %1103 = dma.done.wait [#allocation6], 64  }
  0x19   :  { %1104 = vsyncadd [#allocation6], 4294967232  ;;  %v1109_v0 = vmov 0.0   ;;  %v1110_v1 = vmov 0   ;;  %v54_v2 = vld [vmem:[#allocation2] sm:$0xff]  ;;  %vm71_vm0 = vcmask 1043456   ;;  %v250_v63 = vlaneseq }
  0x1a   :  { %144 = vmatprep.mubr.f32.mxu0 %v1109_v0  ;;  %215 = vmatprep.mubr.f32.mxu1 %v1109_v0  ;;  %v55_v3 = vld [vmem:[#allocation2 + $0x8] sm:$0xff]  ;;  %v65_v4 = vcombine.high %v54_v2, %v54_v2  ;;  %v57_v6 = vld [vmem:[%s1506_s2] sm:$0xff]  ;;  %vm67_vm1 = vcmask 31744   ;;  %s1112_s2 = smov 112   ;;  %s1113_s17 = smov 113   ;;  %vm597_vm14 = vcmask 588800  }
  0x1b   :  { %1037 = vset.pattern.permute.xlu0 %v1110_v1  ;;  %1038 = vset.pattern.permute.xlu1 %v1110_v1  ;;  %v66_v5 = vcombine.high %v55_v3, %v55_v3  ;;  %v56_v7 = vld [vmem:[%s1505_s1] sm:$0xff]  ;;  %s1111_s1 = smov 111   ;;  %s1114_s18 = smov 127   ;;  %v1231_v1 = vshrl.u32 %v250_v63, 7 }
  0x1c   :  { %60 = vperm.xlu0 %1037, %v57_v6   ;;  %942 = vmatprep.subr.msk.mxu0 %vm71_vm0, %v65_v4  ;;  %s1115_s19 = smov 1   ;;  %s1116_s20 = smov 15   ;;  %v764_v61 = vld [vmem:[%s1510_s6] sm:$0xf] }
  0x1d   :  { %945 = vmatprep.subr.msk.mxu1 %vm71_vm0, %v66_v5  ;;  %943 = vmatpush1.msk.msra.mxu0 %vm71_vm0, %v54_v2  ;;  %s1117_s21 = smov 16   ;;  %s1118_s22 = smov 17   ;;  %v591_v62 = vld [vmem:[%s1508_s4] sm:$0xff]  ;;  %v1233_v2 = vand.u32 127, %v250_v63  ;;  %v1243_v5 = vsub.s32 2, %v1231_v1  ;;  %v1246_v6 = vsub.s32 3, %v1231_v1 }
  0x1e   :  { %946 = vmatpush1.msk.msra.mxu1 %vm71_vm0, %v55_v3  ;;  %944 = vmatmul.mubr.msk.f32.vlgmr.msra.gmra.mxu0 %vm67_vm1, %v56_v7  ;;  %v1238_v3 = vld [vmem:[%s1511_s7 + $0x20] sm:$0xf] }
  0x1f   :  { %947 = vmatmul.mubr.msk.f32.vlgmr.msra.gmra.mxu1 %vm67_vm1, %v56_v7  ;;  %665 = vmatprep.mubr.f32.mxu0 %v1109_v0  ;;  %vm558_vm6 = vcmp.lt.s32.totalorder %v1233_v2, 111  ;;  %vm518_vm7 = vcmp.lt.s32.totalorder %v1233_v2, 112  ;;  %vm478_vm8 = vcmp.lt.s32.totalorder %v1233_v2, 113  ;;  %vm438_vm9 = vcmp.lt.s32.totalorder %v1233_v2, 127 }
  0x20   :  { %736 = vmatprep.mubr.f32.mxu1 %v1109_v0  ;;  %vm371_vm10 = vcmp.lt.s32.totalorder %v1233_v2, 1  ;;  %vm331_vm11 = vcmp.lt.s32.totalorder %v1233_v2, 15  ;;  %vm291_vm12 = vcmp.lt.s32.totalorder %v1233_v2, 16  ;;  %vm252_vm13 = vcmp.lt.s32.totalorder %v1233_v2, 17 }
  0x97   :  { %v61_v8 = vpop.permute.xlu0 %60 }
  0xde   :  { %v146_v9 = vpop.f32.mrf.mxu0 }
  0xdf   :  { %v217_v10 = vpop.f32.mrf.mxu1  ;;  %v147_v11 = vadd.f32 %v146_v9, %v61_v8  ;;  %v581_v9 = vrot.slane %v1238_v3, %v1246_v6 }
  0xe0   :  { %v218_v12 = vadd.f32 %v217_v10, %v61_v8  ;;  %v148_v13 = vpop.f32.mrf.mxu0 }
  0xe1   :  { %v219_v14 = vpop.f32.mrf.mxu1  ;;  %v222_v15 = vmax.f32 %v147_v11, 0.0  ;;  %v149_v17 = vadd.f32 %v148_v13, %v61_v8 }
  0xe2   :  { %v224_v16 = vmax.f32 %v218_v12, 0.0  ;;  %v220_v18 = vadd.f32 %v219_v14, %v61_v8  ;;  %v577_v8 = vrot.slane %v1238_v3, %v1243_v5 }
  0xe3   :  { %v226_v19 = vmin.f32 %v222_v15, 10.0  ;;  %v223_v21 = vmax.f32 %v149_v17, 0.0 }
  0xe4   :  { %v228_v20 = vmin.f32 %v224_v16, 10.0  ;;  %v225_v22 = vmax.f32 %v220_v18, 0.0  ;;  %v1270_v18 = vld [vmem:[%s1511_s7 + $0x1c] sm:$0xf] }
  0xe5   :  { %v230_v23 = vmul.f32 25.5, %v226_v19  ;;  %v227_v25 = vmin.f32 %v223_v21, 10.0  ;;  %v537_v19 = vrot.slane %v1270_v18, %v1243_v5 }
  0xe6   :  { %v232_v24 = vmul.f32 25.5, %v228_v20  ;;  %v229_v26 = vmin.f32 %v225_v22, 10.0  ;;  %v541_v20 = vrot.slane %v1270_v18, %v1246_v6 }
  0xe7   :  { %v962_v27 = vcvt.f32.s32 %v230_v23  ;;  %v231_v29 = vmul.f32 25.5, %v227_v25  ;;  %v960_v31 = vand.u32 2147483647, %v230_v23  ;;  %v965_v37 = vand.u32 2147483648, %v230_v23 }
  0xe8   :  { %v978_v28 = vcvt.f32.s32 %v232_v24  ;;  %v233_v30 = vmul.f32 25.5, %v229_v26  ;;  %v976_v33 = vand.u32 2147483647, %v232_v24  ;;  %v981_v40 = vand.u32 2147483648, %v232_v24 }
  0xe9   :  { %v963_v32 = vcvt.s32.f32 %v962_v27  ;;  %v970_v35 = vcvt.f32.s32 %v231_v29  ;;  %vm961_vm2 = vcmp.lt.f32.partialorder %v960_v31, 8388608.0  ;;  %v973_v48 = vand.u32 2147483648, %v231_v29 }
  0xea   :  { %v979_v34 = vcvt.s32.f32 %v978_v28  ;;  %v986_v38 = vcvt.f32.s32 %v233_v30  ;;  %vm977_vm3 = vcmp.lt.f32.partialorder %v976_v33, 8388608.0  ;;  %v984_v46 = vand.u32 2147483647, %v233_v30 }
  0xeb   :  { %v964_v36 = vand.u32 2147483647, %v963_v32  ;;  %v971_v41 = vcvt.s32.f32 %v970_v35  ;;  %v989_v50 = vand.u32 2147483648, %v233_v30  ;;  %v968_v53 = vand.u32 2147483647, %v231_v29 }
  0xec   :  { %v980_v39 = vand.u32 2147483647, %v979_v34  ;;  %v987_v43 = vcvt.s32.f32 %v986_v38  ;;  %vm985_vm4 = vcmp.lt.f32.partialorder %v984_v46, 8388608.0 }
  0xed   :  { %v966_v42 = vor.u32 %v965_v37, %v964_v36  ;;  %v972_v45 = vand.u32 2147483647, %v971_v41  ;;  %vm969_vm5 = vcmp.lt.f32.partialorder %v968_v53, 8388608.0  ;;  %v1341_v53 = vld [vmem:[%s1511_s7 + $0xc] sm:$0xf] }
  0xee   :  { %v982_v44 = vor.u32 %v981_v40, %v980_v39  ;;  %v988_v49 = vand.u32 2147483647, %v987_v43  ;;  %v1314_v40 = vld [vmem:[%s1511_s7 + $0x14] sm:$0xf]  ;;  %v1323_v43 = vld [vmem:[%s1511_s7 + $0x10] sm:$0xf] }
  0xef   :  { %v967_v47 = vsel %vm961_vm2, %v966_v42, %v230_v23  ;;  %v974_v55 = vor.u32 %v973_v48, %v972_v45  ;;  %v457_v41 = vrot.slane %v1314_v40, %v1243_v5  ;;  %v461_v42 = vrot.slane %v1314_v40, %v1246_v6 }
  0xf0   :  { %v1181_v51 = vmul.f32 0.039215688, %v967_v47  ;;  %v983_v52 = vsel %vm977_vm3, %v982_v44, %v232_v24  ;;  %v990_v56 = vor.u32 %v989_v50, %v988_v49  ;;  %v421_v45 = vrot.slane %v1323_v43, %v1246_v6 }
  0xf1   :  { %v1183_v54 = vmul.f32 0.039215688, %v983_v52  ;;  %v975_v59 = vsel %vm969_vm5, %v974_v55, %v231_v29  ;;  %v1292_v29 = vld [vmem:[%s1511_s7 + $0x18] sm:$0xf]  ;;  %v417_v49 = vrot.slane %v1323_v43, %v1243_v5  ;;  %vm770_vm3 = vcmask 64512  }
  0xf2   :  { %550 = vrot.lane.b32.xlu0 %v1181_v51, %s1111_s1  ;;  %v991_v57 = vsel %vm985_vm4, %v990_v56, %v233_v30  ;;  %v1194_v60 = vmul.f32 0.039215688, %v975_v59  ;;  %v497_v30 = vrot.slane %v1292_v29, %v1243_v5  ;;  %v501_v31 = vrot.slane %v1292_v29, %v1246_v6 }
  0xf3   :  { %554 = vrot.lane.b32.xlu1 %v1183_v54, %s1111_s1  ;;  %v1189_v58 = vmul.f32 0.039215688, %v991_v57  ;;  %v428_v59 = vmul.f32 %v417_v49, %v1183_v54 }
  0xf5   :  { %v429_v56 = vmul.f32 %v421_v45, %v1189_v58 }
  0xf6   :  { %556 = vrot.lane.b32.xlu0 %v1189_v58, %s1111_s1 }
  0xf7   :  { %510 = vrot.lane.b32.xlu1 %v1181_v51, %s1112_s2 }
  0xfa   :  { %512 = vrot.lane.b32.xlu0 %v1194_v60, %s1112_s2 }
  0xfb   :  { %514 = vrot.lane.b32.xlu1 %v1183_v54, %s1112_s2 }
  0xfe   :  { %516 = vrot.lane.b32.xlu0 %v1189_v58, %s1112_s2 }
  0xff   :  { %470 = vrot.lane.b32.xlu1 %v1181_v51, %s1113_s17 }
 0x102   :  { %472 = vrot.lane.b32.xlu0 %v1194_v60, %s1113_s17 }
 0x103   :  { %474 = vrot.lane.b32.xlu1 %v1183_v54, %s1113_s17 }
 0x106   :  { %476 = vrot.lane.b32.xlu0 %v1189_v58, %s1113_s17 }
 0x107   :  { %430 = vrot.lane.b32.xlu1 %v1181_v51, %s1114_s18 }
 0x10a   :  { %432 = vrot.lane.b32.xlu0 %v1194_v60, %s1114_s18 }
 0x10b   :  { %434 = vrot.lane.b32.xlu1 %v1183_v54, %s1114_s18 }
 0x10e   :  { %436 = vrot.lane.b32.xlu0 %v1189_v58, %s1114_s18 }
 0x10f   :  { %363 = vrot.lane.b32.xlu1 %v1181_v51, %s1115_s19 }
 0x112   :  { %365 = vrot.lane.b32.xlu0 %v1194_v60, %s1115_s19 }
 0x113   :  { %367 = vrot.lane.b32.xlu1 %v1183_v54, %s1115_s19 }
 0x116   :  { %369 = vrot.lane.b32.xlu0 %v1189_v58, %s1115_s19 }
 0x117   :  { %323 = vrot.lane.b32.xlu1 %v1181_v51, %s1116_s20 }
 0x11a   :  { %325 = vrot.lane.b32.xlu0 %v1194_v60, %s1116_s20 }
 0x11b   :  { %327 = vrot.lane.b32.xlu1 %v1183_v54, %s1116_s20 }
 0x11e   :  { %329 = vrot.lane.b32.xlu0 %v1189_v58, %s1116_s20 }
 0x11f   :  { %552 = vrot.lane.b32.xlu1 %v1194_v60, %s1111_s1 }
 0x122   :  { %285 = vrot.lane.b32.xlu0 %v1194_v60, %s1117_s21 }
 0x123   :  { %283 = vrot.lane.b32.xlu1 %v1181_v51, %s1117_s21 }
 0x126   :  { %289 = vrot.lane.b32.xlu0 %v1189_v58, %s1117_s21 }
 0x127   :  { %287 = vrot.lane.b32.xlu1 %v1183_v54, %s1117_s21 }
 0x12a   :  { %244 = vrot.lane.b32.xlu0 %v1194_v60, %s1118_s22 }
 0x12b   :  { %242 = vrot.lane.b32.xlu1 %v1181_v51, %s1118_s22 }
 0x12e   :  { %248 = vrot.lane.b32.xlu0 %v1189_v58, %s1118_s22 }
 0x12f   :  { %246 = vrot.lane.b32.xlu1 %v1183_v54, %s1118_s22 }
 0x132   :  { %767 = vperm.xlu0 %1037, %v764_v61   ;;  %v394_v61 = vrot.slane %v1341_v53, %v1246_v6 }
 0x133   :  { %594 = vperm.xlu1 %1038, %v591_v62   ;;  %v390_v62 = vrot.slane %v1341_v53, %v1243_v5 }
 0x164   :  { %v1240_v4 = vpop.permute.xlu0 %550 }
 0x165   :  { %v1248_v7 = vpop.permute.xlu1 %554 }
 0x168   :  { %v557_v10 = vpop.permute.xlu0 %556 }
 0x169   :  { %v1255_v11 = vpop.permute.xlu1 %510  ;;  %v559_v12 = vsel %vm558_vm6, %v1248_v7, %v557_v10  ;;  %v562_v13 = vsel %vm558_vm6, %v557_v10, %v1240_v4 }
 0x16a   :  { %v588_v14 = vmul.f32 %v577_v8, %v559_v12  ;;  %v589_v15 = vmul.f32 %v581_v9, %v562_v13  ;;  %v1365_v12 = vld [vmem:[%s1511_s7 + $0x8] sm:$0xf] }
 0x16c   :  { %686 = vmatprep.subr.mxu1 %v589_v15  ;;  %v1263_v16 = vpop.permute.xlu0 %512  ;;  %v1373_v15 = vsub.s32 1, %v1231_v1 }
 0x16d   :  { %v1265_v17 = vpop.permute.xlu1 %514  ;;  %687 = vmatpush1.msra.mxu1 %v588_v14  ;;  %v1370_v14 = vsub.s32 0, %v1231_v1 }
 0x16f   :  { %v449_v49 = vrot.slane %v1314_v40, %v1370_v14 }
 0x170   :  { %v517_v21 = vpop.permute.xlu0 %516 }
 0x171   :  { %v1277_v22 = vpop.permute.xlu1 %470  ;;  %v519_v23 = vsel %vm518_vm7, %v1265_v17, %v517_v21  ;;  %v522_v24 = vsel %vm518_vm7, %v517_v21, %v1255_v11  ;;  %v350_v21 = vrot.slane %v1365_v12, %v1243_v5 }
 0x172   :  { %v548_v25 = vmul.f32 %v537_v19, %v519_v23  ;;  %v549_v26 = vmul.f32 %v541_v20, %v522_v24  ;;  %v354_v20 = vrot.slane %v1365_v12, %v1246_v6  ;;  %v569_v23 = vrot.slane %v1238_v3, %v1370_v14 }
 0x173   :  { %v573_v24 = vrot.slane %v1238_v3, %v1373_v15 }
 0x174   :  { %688 = vmatprep.subr.mxu1 %v549_v26  ;;  %v1285_v27 = vpop.permute.xlu0 %472  ;;  %v529_v26 = vrot.slane %v1270_v18, %v1370_v14 }
 0x175   :  { %v1287_v28 = vpop.permute.xlu1 %474  ;;  %689 = vmatpush1.msra.mxu1 %v548_v25 }
 0x178   :  { %v477_v32 = vpop.permute.xlu0 %476 }
 0x179   :  { %v1299_v33 = vpop.permute.xlu1 %430  ;;  %v479_v34 = vsel %vm478_vm8, %v1287_v28, %v477_v32  ;;  %v482_v35 = vsel %vm478_vm8, %v477_v32, %v1277_v22 }
 0x17a   :  { %v508_v36 = vmul.f32 %v497_v30, %v479_v34  ;;  %v509_v37 = vmul.f32 %v501_v31, %v482_v35  ;;  %v533_v30 = vrot.slane %v1270_v18, %v1373_v15  ;;  %v493_v31 = vrot.slane %v1292_v29, %v1373_v15 }
 0x17b   :  { %v520_v34 = vsel %vm518_vm7, %v1263_v16, %v1265_v17  ;;  %v489_v17 = vrot.slane %v1292_v29, %v1370_v14  ;;  %v453_v29 = vrot.slane %v1314_v40, %v1373_v15 }
 0x17c   :  { %690 = vmatprep.subr.mxu1 %v509_v37  ;;  %v1307_v38 = vpop.permute.xlu0 %432  ;;  %v521_v37 = vsel %vm518_vm7, %v1255_v11, %v1263_v16  ;;  %v547_v11 = vmul.f32 %v533_v30, %v520_v34  ;;  %v481_v16 = vsel %vm478_vm8, %v1277_v22, %v1285_v27 }
 0x17d   :  { %v1309_v39 = vpop.permute.xlu1 %434  ;;  %691 = vmatpush1.msra.mxu1 %v508_v36 }
 0x180   :  { %v437_v44 = vpop.permute.xlu0 %436 }
 0x181   :  { %v1328_v46 = vpop.permute.xlu1 %363  ;;  %v439_v47 = vsel %vm438_vm9, %v1309_v39, %v437_v44  ;;  %v442_v48 = vsel %vm438_vm9, %v437_v44, %v1299_v33 }
 0x182   :  { %v468_v50 = vmul.f32 %v457_v41, %v439_v47  ;;  %v469_v52 = vmul.f32 %v461_v42, %v442_v48  ;;  %v409_v47 = vrot.slane %v1323_v43, %v1370_v14 }
 0x184   :  { %692 = vmatprep.subr.mxu1 %v469_v52  ;;  %v1343_v55 = vpop.permute.xlu0 %365 }
 0x185   :  { %v368_v57 = vpop.permute.xlu1 %367  ;;  %693 = vmatpush1.msra.mxu1 %v468_v50  ;;  %v948_v50 = vld [vmem:[%s1511_s7 + $0x4] sm:$0xf] }
 0x186   :  { %694 = vmatprep.subr.mxu1 %v429_v56  ;;  %v373_v63 = vsel %vm371_vm10, %v1343_v55, %v368_v57  ;;  %v310_v52 = vrot.slane %v948_v50, %v1243_v5  ;;  %v314_v40 = vrot.slane %v948_v50, %v1246_v6  ;;  %v506_v56 = vmul.f32 %v489_v17, %v481_v16 }
 0x187   :  { %695 = vmatpush1.msra.mxu1 %v428_v59  ;;  %v401_v10 = vmul.f32 %v390_v62, %v373_v63  ;;  %v426_v59 = vmul.f32 %v409_v47, %v1181_v51  ;;  %v386_v62 = vrot.slane %v1341_v53, %v1373_v15  ;;  %v382_v63 = vrot.slane %v1341_v53, %v1370_v14  ;;  %v257_v53 = vld [vmem:[%s1511_s7] sm:$0xf] }
 0x188   :  { %v1355_v8 = vpop.permute.xlu0 %369 }
 0x189   :  { %v1357_v58 = vpop.permute.xlu1 %323  ;;  %v372_v54 = vsel %vm371_vm10, %v368_v57, %v1355_v8 }
 0x18a   :  { %v402_v9 = vmul.f32 %v394_v61, %v372_v54  ;;  %v374_v54 = vsel %vm371_vm10, %v1328_v46, %v1343_v55 }
 0x18c   :  { %696 = vmatprep.subr.mxu1 %v402_v9  ;;  %v1367_v13 = vpop.permute.xlu0 %325  ;;  %v375_v9 = vsel %vm371_vm10, %v1355_v8, %v1328_v46  ;;  %v400_v8 = vmul.f32 %v386_v62, %v374_v54 }
 0x18d   :  { %v328_v19 = vpop.permute.xlu1 %327  ;;  %697 = vmatpush1.msra.mxu1 %v401_v10  ;;  %v346_v10 = vrot.slane %v1365_v12, %v1373_v15 }
 0x18e   :  { %v333_v1 = vsel %vm331_vm11, %v1367_v13, %v328_v19 }
 0x18f   :  { %v361_v41 = vmul.f32 %v350_v21, %v333_v1  ;;  %v342_v21 = vrot.slane %v1365_v12, %v1370_v14  ;;  %v399_v12 = vmul.f32 %v382_v63, %v375_v9 }
 0x190   :  { %v1387_v25 = vpop.permute.xlu0 %329 }
 0x191   :  { %v553_v32 = vpop.permute.xlu1 %552  ;;  %v332_v3 = vsel %vm331_vm11, %v328_v19, %v1387_v25  ;;  %v335_v1 = vsel %vm331_vm11, %v1387_v25, %v1357_v58  ;;  %v274_v25 = vrot.slane %v257_v53, %v1246_v6 }
 0x192   :  { %v560_v35 = vsel %vm558_vm6, %v553_v32, %v1248_v7  ;;  %v561_v18 = vsel %vm558_vm6, %v1240_v4, %v553_v32  ;;  %v362_v36 = vmul.f32 %v354_v20, %v332_v3  ;;  %v480_v7 = vsel %vm478_vm8, %v1285_v27, %v1287_v28 }
 0x193   :  { %v586_v42 = vmul.f32 %v569_v23, %v561_v18  ;;  %v587_v44 = vmul.f32 %v573_v24, %v560_v35  ;;  %v413_v4 = vrot.slane %v1323_v43, %v1373_v15  ;;  %v546_v28 = vmul.f32 %v529_v26, %v521_v37 }
 0x194   :  { %698 = vmatprep.subr.mxu1 %v362_v36  ;;  %v286_v45 = vpop.permute.xlu0 %285  ;;  %v440_v43 = vsel %vm438_vm9, %v1307_v38, %v1309_v39  ;;  %v507_v22 = vmul.f32 %v493_v31, %v480_v7  ;;  %v441_v27 = vsel %vm438_vm9, %v1299_v33, %v1307_v38  ;;  %v334_v20 = vsel %vm331_vm11, %v1357_v58, %v1367_v13  ;;  %v590_v7 = vld [vmem:[%s1507_s3] sm:$0xff]  ;;  %s1119_s3 = smov [#allocation7]  }
 0x195   :  { %615 = vmatprep.subr.mxu0 %v587_v44  ;;  %v284_v48 = vpop.permute.xlu1 %283  ;;  %699 = vmatpush1.msra.mxu1 %v361_v41  ;;  %v427_v39 = vmul.f32 %v413_v4, %v1194_v60  ;;  %v467_v61 = vmul.f32 %v453_v29, %v440_v43  ;;  %v466_v38 = vmul.f32 %v449_v49, %v441_v27  ;;  %s932_s18 = sshll.u32 %s1119_s3, 4  ;;  %s933_s18 = int_to_ptr.vmem [resolvable:$true] %s932_s18 }
 0x196   :  { %616 = vmatpush1.msra.mxu0 %v586_v42  ;;  %v306_v23 = vrot.slane %v948_v50, %v1373_v15  ;;  %v302_v24 = vrot.slane %v948_v50, %v1370_v14  ;;  %v266_v13 = vrot.slane %v257_v53, %v1373_v15  ;;  %v294_v30 = vsel %vm291_vm12, %v284_v48, %v286_v45  ;;  %s1081_s19 = scalar_lea.vmem %s933_s18, 256  ;;  %p1086_p11 = scmp.lt.s32.totalorder %s933_s18, %s933_s18 }
 0x197   :  { %617 = vmatprep.subr.mxu0 %v547_v11  ;;  %v262_v31 = vrot.slane %v257_v53, %v1370_v14  ;;  %v360_v32 = vmul.f32 %v346_v10, %v334_v20  ;;  %v270_v58 = vrot.slane %v257_v53, %v1243_v5  ;;  %v359_v34 = vmul.f32 %v342_v21, %v335_v1  ;;  %p1082_p10 = scmp.ne.s32.totalorder %s933_s18, %s1081_s19  ;;  %p1087_p12 = scmp.lt.s32.totalorder %s1081_s19, %s1081_s19 }
 0x198   :  { %618 = vmatpush1.msra.mxu0 %v546_v28  ;;  %v290_v57 = vpop.permute.xlu0 %289  ;;  %v320_v18 = vmul.f32 %v306_v23, %v294_v30 }
 0x199   :  { %v288_v33 = vpop.permute.xlu1 %287  ;;  %619 = vmatprep.subr.mxu0 %v507_v22  ;;  %v295_v3 = vsel %vm291_vm12, %v290_v57, %v284_v48  ;;  %p1088_p13 = por %p1087_p12, %p1086_p11 }
 0x19a   :  { %v293_v51 = vsel %vm291_vm12, %v286_v45, %v288_v33  ;;  %v292_v60 = vsel %vm291_vm12, %v288_v33, %v290_v57  ;;  %620 = vmatpush1.msra.mxu0 %v506_v56  ;;  %v319_v37 = vmul.f32 %v302_v24, %v295_v3 }
 0x19b   :  { %v321_v55 = vmul.f32 %v310_v52, %v293_v51  ;;  %v322_v19 = vmul.f32 %v314_v40, %v292_v60  ;;  %621 = vmatprep.subr.mxu0 %v467_v61  ;;  %p1089_p0 = pnand %p1088_p13, %p1082_p10 }
 0x19c   :  { %622 = vmatpush1.msra.mxu0 %v466_v38  ;;  %v245_v46 = vpop.permute.xlu0 %244 }
 0x19d   :  { %v243_v26 = vpop.permute.xlu1 %242  ;;  %623 = vmatprep.subr.mxu0 %v427_v39  ;;  %700 = vmatprep.subr.mxu1 %v322_v19 }
 0x19e   :  { %624 = vmatpush1.msra.mxu0 %v426_v59  ;;  %701 = vmatpush1.msra.mxu1 %v321_v55  ;;  %v255_v15 = vsel %vm252_vm13, %v243_v26, %v245_v46 }
 0x19f   :  { %625 = vmatprep.subr.mxu0 %v400_v8  ;;  %v280_v42 = vmul.f32 %v266_v13, %v255_v15  ;;  %v763_v15 = vld [vmem:[#allocation5] sm:$0xf] }
 0x1a0   :  { %626 = vmatpush1.msra.mxu0 %v399_v12  ;;  %v249_v35 = vpop.permute.xlu0 %248 }
 0x1a1   :  { %v247_v36 = vpop.permute.xlu1 %246  ;;  %v256_v14 = vsel %vm252_vm13, %v249_v35, %v243_v26  ;;  %627 = vmatprep.subr.mxu0 %v360_v32 }
 0x1a2   :  { %v254_v41 = vsel %vm252_vm13, %v245_v46, %v247_v36  ;;  %v253_v5 = vsel %vm252_vm13, %v247_v36, %v249_v35  ;;  %v279_v6 = vmul.f32 %v262_v31, %v256_v14  ;;  %628 = vmatpush1.msra.mxu0 %v359_v34 }
 0x1a3   :  { %v281_v44 = vmul.f32 %v270_v58, %v254_v41  ;;  %v282_v17 = vmul.f32 %v274_v25, %v253_v5  ;;  %629 = vmatprep.subr.mxu0 %v320_v18 }
 0x1a4   :  { %630 = vmatpush1.msra.mxu0 %v319_v37 }
 0x1a5   :  { %631 = vmatprep.subr.mxu0 %v280_v42  ;;  %702 = vmatprep.subr.mxu1 %v282_v17 }
 0x1a6   :  { %632 = vmatpush1.msra.mxu0 %v279_v6  ;;  %703 = vmatpush1.msra.mxu1 %v281_v44 }
 0x1a7   :  { %956 = vmatmul.mubr.msk.f32.vlgmr.msra.gmra.mxu0 %vm597_vm14, %v590_v7  ;;  %957 = vmatmul.mubr.msk.f32.vlgmr.msra.gmra.mxu1 %vm597_vm14, %v590_v7 }
 0x1a8   :  { %838 = vmatprep.mubr.f32.mxu0 %v1109_v0  ;;  %909 = vmatprep.mubr.f32.mxu1 %v1109_v0 }
 0x1ad   :  { %v768_v37 = vpop.permute.xlu0 %767 }
 0x1ae   :  { %v595_v2 = vpop.permute.xlu1 %594 }
 0x267   :  { %v667_v45 = vpop.f32.mrf.mxu0  ;;  %v738_v4 = vpop.f32.mrf.mxu1 }
 0x268   :  { %v668_v47 = vadd.f32 %v667_v45, %v595_v2  ;;  %v739_v11 = vadd.f32 %v738_v4, %v595_v2 }
 0x269   :  { %v669_v16 = vpop.f32.mrf.mxu0  ;;  %v740_v29 = vpop.f32.mrf.mxu1 }
 0x26a   :  { %v743_v48 = vmax.f32 %v668_v47, 0.0  ;;  %v745_v28 = vmax.f32 %v739_v11, 0.0  ;;  %v670_v49 = vadd.f32 %v669_v16, %v595_v2  ;;  %v741_v43 = vadd.f32 %v740_v29, %v595_v2 }
 0x26c   :  { %v747_v50 = vmin.f32 %v743_v48, 10.0  ;;  %v749_v22 = vmin.f32 %v745_v28, 10.0  ;;  %v744_v27 = vmax.f32 %v670_v49, 0.0  ;;  %v746_v52 = vmax.f32 %v741_v43, 0.0 }
 0x26e   :  { %v751_v40 = vmul.f32 25.5, %v747_v50  ;;  %v753_v56 = vmul.f32 25.5, %v749_v22  ;;  %v748_v57 = vmin.f32 %v744_v27, 10.0  ;;  %v750_v39 = vmin.f32 %v746_v52, 10.0 }
 0x270   :  { %v994_v0 = vcvt.f32.s32 %v751_v40  ;;  %v1010_v59 = vcvt.f32.s32 %v753_v56  ;;  %v752_v61 = vmul.f32 25.5, %v748_v57  ;;  %v754_v62 = vmul.f32 25.5, %v750_v39 }
 0x271   :  { %v992_v33 = vand.u32 2147483647, %v751_v40  ;;  %v997_v53 = vand.u32 2147483648, %v751_v40  ;;  %v1008_v9 = vand.u32 2147483647, %v753_v56  ;;  %v1013_v55 = vand.u32 2147483648, %v753_v56 }
 0x272   :  { %v995_v63 = vcvt.s32.f32 %v994_v0  ;;  %v1011_v38 = vcvt.s32.f32 %v1010_v59  ;;  %v1002_v54 = vcvt.f32.s32 %v752_v61  ;;  %v1018_v51 = vcvt.f32.s32 %v754_v62 }
 0x273   :  { %v1005_v23 = vand.u32 2147483648, %v752_v61  ;;  %v1000_v24 = vand.u32 2147483647, %v752_v61  ;;  %v1016_v46 = vand.u32 2147483647, %v754_v62  ;;  %v1021_v1 = vand.u32 2147483648, %v754_v62 }
 0x274   :  { %v996_v60 = vand.u32 2147483647, %v995_v63  ;;  %v1012_v10 = vand.u32 2147483647, %v1011_v38  ;;  %v1003_v19 = vcvt.s32.f32 %v1002_v54  ;;  %v1019_v20 = vcvt.s32.f32 %v1018_v51 }
 0x275   :  { %vm993_vm15 = vcmp.lt.f32.partialorder %v992_v33, 8388608.0  ;;  %vm1009_vm0 = vcmp.lt.f32.partialorder %v1008_v9, 8388608.0  ;;  %vm1001_vm1 = vcmp.lt.f32.partialorder %v1000_v24, 8388608.0  ;;  %vm1017_vm2 = vcmp.lt.f32.partialorder %v1016_v46, 8388608.0 }
 0x276   :  { %v998_v21 = vor.u32 %v997_v53, %v996_v60  ;;  %v1014_v8 = vor.u32 %v1013_v55, %v1012_v10  ;;  %v1004_v26 = vand.u32 2147483647, %v1003_v19  ;;  %v1020_v13 = vand.u32 2147483647, %v1019_v20 }
 0x278   :  { %v1006_v12 = vor.u32 %v1005_v23, %v1004_v26  ;;  %v1022_v30 = vor.u32 %v1021_v1, %v1020_v13  ;;  %v999_v31 = vsel %vm993_vm15, %v998_v21, %v751_v40  ;;  %v1015_v32 = vsel %vm1009_vm0, %v1014_v8, %v753_v56 }
 0x279   :  { %v759_v35 = vmul.f32 0.039215688, %v999_v31  ;;  %v761_v18 = vmul.f32 0.039215688, %v1015_v32 }
 0x27a   :  { %v1007_v3 = vsel %vm1001_vm1, %v1006_v12, %v752_v61  ;;  %v1023_v58 = vsel %vm1017_vm2, %v1022_v30, %v754_v62 }
 0x27b   :  { %v760_v25 = vmul.f32 0.039215688, %v1007_v3  ;;  %v762_v34 = vmul.f32 0.039215688, %v1023_v58 }
 0x27d   :  { %804 = vmatprep.subr.mxu0 %v760_v25  ;;  %875 = vmatprep.subr.mxu1 %v762_v34 }
 0x27e   :  { %805 = vmatpush1.msra.mxu0 %v759_v35  ;;  %876 = vmatpush1.msra.mxu1 %v761_v18 }
 0x27f   :  { %958 = vmatmul.mubr.msk.f32.vlgmr.msra.gmra.mxu0 %vm770_vm3, %v763_v15  ;;  %959 = vmatmul.mubr.msk.f32.vlgmr.msra.gmra.mxu1 %vm770_vm3, %v763_v15 }
 0x33f   :  { %v840_v36 = vpop.f32.mrf.mxu0  ;;  %v911_v14 = vpop.f32.mrf.mxu1 }
 0x340   :  { %v841_v6 = vadd.f32 %v840_v36, %v768_v37  ;;  %v912_v42 = vadd.f32 %v911_v14, %v768_v37 }
 0x341   :  { %v842_v41 = vpop.f32.mrf.mxu0  ;;  %v913_v5 = vpop.f32.mrf.mxu1 }
 0x342   :  { %v843_v44 = vadd.f32 %v842_v41, %v768_v37  ;;  %v914_v17 = vadd.f32 %v913_v5, %v768_v37 }
 0x344   :  { %v920_v7 = vcombine.low %v841_v6, %v843_v44  ;;  %v921_v2 = vcombine.low %v912_v42, %v914_v17 }
 0x346   :  { %924 = vst [vmem:[#allocation7] sm:$0xff] %v920_v7  ;;  %925 = vst [vmem:[#allocation7 + $0x8] sm:$0xff] %v921_v2 }
 0x347   :  { %1092 = shalt.err (!%p1089_p0)
}
 0x348   :  { %935 = dma.vmem_to_hbm [thread:$0]  %s933_s18, 256, %s1512_s8, [#allocation4]  }
 0x349   :  { %1105 = dma.done.wait [#allocation4], 256  }
 0x34a   :  { %1106 = vsyncadd [#allocation4], 4294967040 }
 0x34b   :  { %939 = vsyncpa [#allocation3], 1 }
 0x34c   :  { %940 = vsyncpa [#allocation6], 1 }
 0x34d   :  { %941 = vsyncpa [#allocation4], 1 }

</bundles_post_ra>
